<compile_context>
chip_gen: v7x
topology: tpu7x:2x2x1
jax: 0.10.0
libtpu: 0.0.40
codegen_flags: <defaults>
</compile_context>

<pallas_src>
import functools

import jax
import jax.numpy as jnp
from jax.experimental import pallas as pl
from jax.experimental.pallas import tpu as pltpu

_LANE = 128
_SUBLANE = 8


def _cdiv(a, b):
    return -(-a // b)


def _round_up(x, m):
    return _cdiv(x, m) * m


def scorer_kernel(x_ref, w_ref, b_ref, o_ref):
    # Hot path: MXU matmul (f32 accumulate) + f32 bias add, then store only the
    # real K output columns (unpadded block -> HBM write is B*K*itemsize).
    x = x_ref[...]                                            # (TB, D)
    w = w_ref[...]                                            # (D, K_pad) lane-aligned
    b = b_ref[...]                                            # (1, K_pad) f32
    acc = jnp.dot(x, w, preferred_element_type=jnp.float32)   # (TB, K_pad) f32
    y = (acc + b).astype(o_ref.dtype)                         # f32 epilogue, then cast
    o_ref[...] = y[:, : o_ref.shape[-1]]                      # keep only the real K cols


@functools.partial(jax.jit, static_argnames=("block_b", "use_bf16_inputs"))
def scorer_forward(x, weight, bias, *, block_b=4096, use_bf16_inputs=False):
    """x: (B, D); weight: (K, D) (PyTorch nn.Linear layout); bias: (K,) -> (B, K)."""
    B, D = x.shape
    K = weight.shape[0]
    out_dtype = x.dtype

    # Lane-align the *weights* only (read once, tiny); the output stays unpadded.
    K_pad = _round_up(K, _LANE)

    # Batch tile: big enough to amortize per-step overhead, small enough for VMEM,
    # and capped at ~ceil(B/2) so the grid has >=2 steps for v7x megacore sharding.
    if B <= _SUBLANE:
        TB = B                                       # single block == full dim (legal)
    else:
        TB = min(block_b, _round_up(_cdiv(B, 2), _SUBLANE))
    grid = (_cdiv(B, TB),)                           # ragged last block handled by Pallas

    if use_bf16_inputs:
        # Only pays off when the cast fuses with x's producer (or x is already bf16);
        # numerics are no longer bit-exact vs f32 nn.Linear (f32 accumulate kept).
        x_in = x.astype(jnp.bfloat16)
        w_in = weight.astype(jnp.bfloat16)
    else:
        x_in, w_in = x, weight

    # (K, D) -> (D, K_pad); zero-padded columns never touch the real outputs.
    w_p = jnp.pad(w_in.T, ((0, 0), (0, K_pad - K)))
    b_p = jnp.pad(bias.astype(jnp.float32).reshape(1, K), ((0, 0), (0, K_pad - K)))

    out = pl.pallas_call(
        scorer_kernel,
        out_shape=jax.ShapeDtypeStruct((B, K), out_dtype),
        grid_spec=pltpu.PrefetchScalarGridSpec(
            num_scalar_prefetch=0,
            grid=grid,
            in_specs=[
                pl.BlockSpec((TB, D), lambda i: (i, 0)),      # x: tiled over batch
                pl.BlockSpec((D, K_pad), lambda i: (0, 0)),   # w: grid-invariant, DMA'd once
                pl.BlockSpec((1, K_pad), lambda i: (0, 0)),   # b: grid-invariant, DMA'd once
            ],
            # Unpadded output block: masked vst in-kernel, but HBM writeback shrinks
            # from B*128*4 to B*K*itemsize bytes (the dominant traffic term before).
            out_specs=pl.BlockSpec((TB, K), lambda i: (i, 0)),
        ),
        compiler_params=pltpu.CompilerParams(
            # Batch tiles are independent -> shard across TensorCores on v7x.
            dimension_semantics=("parallel",),
            # Headroom for larger block_b sweeps; <= v7x 64 MiB physical.
            vmem_limit_bytes=32 * 1024 * 1024,
        ),
        cost_estimate=pl.CostEstimate(
            flops=2 * B * D * K_pad,
            transcendentals=0,
            bytes_accessed=(
                B * D * x_in.dtype.itemsize          # x read
                + D * K_pad * w_p.dtype.itemsize     # padded weight read (once)
                + K_pad * 4                          # bias read (once)
                + B * K * out_dtype.itemsize         # unpadded output write
            ),
        ),
    )(x_in, w_p, b_p)

    return out


if __name__ == "__main__":
    # Small shapes consistent with Scorer(latent_dim, number_of_clusters).
    latent_dim = 32
    number_of_clusters = 10
    batch = 8

    key = jax.random.PRNGKey(0)
    kx, kw, kb = jax.random.split(key, 3)

    x = jax.random.normal(kx, (batch, latent_dim), dtype=jnp.float32)
    # PyTorch nn.Linear layout: weight (out_features, in_features), bias (out_features,).
    bound = 1.0 / (latent_dim ** 0.5)
    weight = jax.random.uniform(kw, (number_of_clusters, latent_dim),
                                minval=-bound, maxval=bound, dtype=jnp.float32)
    bias = jax.random.uniform(kb, (number_of_clusters,),
                              minval=-bound, maxval=bound, dtype=jnp.float32)

    out = scorer_forward(x, weight, bias)
    out = jax.block_until_ready(out)

    # Reference check in plain JAX (same semantics as nn.Linear forward).
    ref = x @ weight.T + bias[None, :]
    assert out.shape == (batch, number_of_clusters)
    assert jnp.allclose(out, ref, atol=1e-5, rtol=1e-5)

    print("KERNEL_OK")
</pallas_src>

<mosaic_0001>
module attributes {stable_mosaic.version = 11 : i64} {
  func.func @scorer_kernel(%arg0: i32, %arg1: memref<8x32xf32, #tpu.memory_space<vmem>>, %arg2: memref<32x128xf32, #tpu.memory_space<vmem>>, %arg3: memref<1x128xf32, #tpu.memory_space<vmem>>, %arg4: memref<8x10xf32, #tpu.memory_space<vmem>>) attributes {dimension_semantics = [#tpu.dimension_semantics<parallel>], iteration_bounds = array<i64: 1>, scalar_prefetch = 0 : i64, scratch_operands = 0 : i64, tpu.core_type = #tpu.core_type<tc>, window_params = [{transform_indices = @transform_0, window_bounds = array<i64: 8, 32>}, {pipeline_mode = #tpu.pipeline_mode<synchronous>, transform_indices = @transform_1, window_bounds = array<i64: 32, 128>}, {pipeline_mode = #tpu.pipeline_mode<synchronous>, transform_indices = @transform_2, window_bounds = array<i64: 1, 128>}, {transform_indices = @transform_3, window_bounds = array<i64: 8, 10>}]} {
    %c0 = arith.constant 0 : index
    %c0_0 = arith.constant 0 : index
    %0 = vector.load %arg1[%c0, %c0_0] : memref<8x32xf32, #tpu.memory_space<vmem>>, vector<8x32xf32>
    %c0_1 = arith.constant 0 : index
    %c0_2 = arith.constant 0 : index
    %1 = vector.load %arg2[%c0_1, %c0_2] : memref<32x128xf32, #tpu.memory_space<vmem>>, vector<32x128xf32>
    %c0_3 = arith.constant 0 : index
    %c0_4 = arith.constant 0 : index
    %2 = vector.load %arg3[%c0_3, %c0_4] : memref<1x128xf32, #tpu.memory_space<vmem>>, vector<1x128xf32>
    %cst = arith.constant dense<0.000000e+00> : vector<8x128xf32>
    %3 = tpu.matmul %0, %1, %cst {dimension_numbers = #tpu.dot_dimension_numbers<[1], [0], [0], [1], [0, 0, 1, 1], [], []>} : vector<8x32xf32>, vector<32x128xf32>, vector<8x128xf32> -> vector<8x128xf32>
    %4 = vector.broadcast %2 : vector<1x128xf32> to vector<8x128xf32>
    %5 = arith.addf %3, %4 : vector<8x128xf32>
    %6 = vector.extract_strided_slice %5 {offsets = [0, 0], sizes = [8, 10], strides = [1, 1]} : vector<8x128xf32> to vector<8x10xf32>
    %c0_5 = arith.constant 0 : index
    %c0_6 = arith.constant 0 : index
    %7 = vector.load %arg4[%c0_5, %c0_6] : memref<8x10xf32, #tpu.memory_space<vmem>>, vector<8x10xf32>
    tpu.vector_store %arg4[%c0_5, %c0_6], %6 {strides = array<i32>} : memref<8x10xf32, #tpu.memory_space<vmem>>, vector<8x10xf32>,
    return
  }
  func.func @transform_0(%arg0: i32) -> (i32, i32) {
    %c0_i32 = arith.constant 0 : i32
    %c0_i32_0 = arith.constant 0 : i32
    return %arg0, %c0_i32 : i32, i32
  }
  func.func @transform_1(%arg0: i32) -> (i32, i32) {
    %c0_i32 = arith.constant 0 : i32
    %c0_i32_0 = arith.constant 0 : i32
    %c0_i32_1 = arith.constant 0 : i32
    return %c0_i32, %c0_i32_0 : i32, i32
  }
  func.func @transform_2(%arg0: i32) -> (i32, i32) {
    %c0_i32 = arith.constant 0 : i32
    %c0_i32_0 = arith.constant 0 : i32
    %c0_i32_1 = arith.constant 0 : i32
    return %c0_i32, %c0_i32_0 : i32, i32
  }
  func.func @transform_3(%arg0: i32) -> (i32, i32) {
    %c0_i32 = arith.constant 0 : i32
    %c0_i32_0 = arith.constant 0 : i32
    return %arg0, %c0_i32 : i32, i32
  }
}

</mosaic_0001>

<bundles_post_ra>
// kernel: scorer_forward.1
= control target key start
LH: loop header
LB: loop body
LE: loop exit
PB: predicated region body
PF: predicated region fallthrough
CT: control target
= control target key end

     0   :  { %v169_v3 = vmov 0.0|0.0   ;;  %vm170_vm0 = vmmov 0   ;;  %v171_v6 = vmov 0.0   ;;  %s223_s0 = inlined_call_operand.vmem [shape: f32[8,32], index: 0, kind: input, shape index: {}]   ;;  %s224_s1 = inlined_call_operand.vmem [shape: f32[32,128], index: 1, kind: input, shape index: {}]   ;;  %s225_s2 = inlined_call_operand.vmem [shape: f32[1,128], index: 2, kind: input, shape index: {}]   ;;  %s226_s3 = inlined_call_operand.hbm [shape: f32[8,10], index: 3, kind: output, shape index: {}]  }
   0x1   :  { %v16_v0 = vld [vmem:[%s224_s1] sm:$0xff]  ;;  %v17_v1 = vld [vmem:[%s224_s1 + $0x8] sm:$0xff]  ;;  %v18_v2 = vld [vmem:[%s224_s1 + $0x10] sm:$0xff]  ;;  %135 = vmatprep.subr.bf16.mxu0 %v169_v3  ;;  %132 = vmatprep.mubr.msk.f32.mxu0 %vm170_vm0, %v171_v6 }
   0x2   :  { %v136_v4 = vpack.c.bf16 %v17_v1, %v16_v0  ;;  %v19_v5 = vld [vmem:[%s224_s1 + $0x18] sm:$0xff] }
   0x3   :  { %8 = vsyncpa [#allocation3], 0  ;;  %v139_v7 = vpack.c.bf16 %v19_v5, %v18_v2  ;;  %v15_v8 = vld [vmem:[%s223_s0] sm:$0xff]  ;;  %vm27_vm1 = vcmask 261120   ;;  %s172_s24 = smov [#allocation2]   ;;  %vm101_vm2 = vcmask 80896  }
   0x4   :  { %137 = vmatpush3.bf16.msra.mxu0 %v136_v4  ;;  %v117_v9 = vld [vmem:[%s225_s2] ss:$0 sm:$0xff]  ;;  %s109_s1 = sshll.u32 %s172_s24, 4  ;;  %s110_s1 = int_to_ptr.vmem [resolvable:$true] %s109_s1 }
   0x5   :  { %138 = vmatprep.subr.bf16.mxu0 %v169_v3  ;;  %s145_s25 = scalar_lea.vmem %s110_s1, 128  ;;  %p150_p1 = scmp.lt.s32.totalorder %s110_s1, %s110_s1 }
   0x6   :  { %p146_p0 = scmp.ne.s32.totalorder %s110_s1, %s145_s25  ;;  %p151_p2 = scmp.lt.s32.totalorder %s145_s25, %s145_s25 }
   0x8   :  { %140 = vmatpush3.bf16.msra.mxu0 %v139_v7  ;;  %p152_p3 = por %p151_p2, %p150_p1 }
   0xa   :  { %p153_p4 = pnand %p152_p3, %p146_p0 }
   0xb   :  { %133 = vmatmul.mubr.msk.f32.vlgmr.msra.gmra.mrb[0].mxu0 %vm27_vm1, %v15_v8 }
  0xde   :  { %v97_v10 = vpop.f32.mrb[0].mxu0 }
  0xdf   :  { %v98_v11 = vadd.f32 %v117_v9, %v97_v10  ;;  %v134_v12 = vpop.f32.mrb[1].mxu0 }
  0xe1   :  { %102 = vst.msk [vmem:[#allocation2] sm:$0xff] %vm101_vm2, %v98_v11 }
  0xe2   :  { %156 = shalt.err (!%p153_p4)
}
  0xe3   :  { %s157_s27 = scalar_lea.hbm %s226_s3, 128 }
  0xe4   :  { %p158_p5 = scmp.ne.s32.totalorder %s226_s3, %s157_s27  ;;  %p161_p6 = scmp.lt.u32.totalorder %s157_s27, %s226_s3 }
  0xe6   :  { %p163_p7 = pnand %p161_p6, %p158_p5 }
  0xe8   :  { %166 = shalt.err (!%p163_p7)
}
  0xe9   :  { %112 = dma.vmem_to_hbm [thread:$0]  %s110_s1, 128, %s226_s3, [#allocation3]  }
  0xea   :  { %167 = dma.done.wait [#allocation3], 128  }
  0xeb   :  { %168 = vsyncadd [#allocation3], 4294967168 }
  0xec   :  { %116 = vsyncpa [#allocation3], 1 }

</bundles_post_ra>
